<compile_context>
chip_gen: v6e
topology: v6e:2x2x1
jax: 0.10.0
libtpu: 0.0.40
codegen_flags: <defaults>
</compile_context>

<pallas_src>
import jax
import jax.numpy as jnp
from jax import lax
from jax.experimental import pallas as pl
from jax.experimental.pallas import tpu as pltpu

LEAK = 0.01        # torch leaky_relu default negative_slope
LANE = 128         # lane-dense padded feature width for every layer
NUM_LAYERS = 6


def _i32(v):
    """Python int (possibly >= 2**31) -> two's-complement int32 constant."""
    v &= 0xFFFFFFFF
    if v >= 1 << 31:
        v -= 1 << 32
    return jnp.int32(v)


def _rshift_logical(x, k):
    # logical right shift for int32: arithmetic shift, then clear the sign-extended bits
    return jnp.bitwise_and(jnp.right_shift(x, k), jnp.int32((1 << (32 - k)) - 1))


def _hash24(shape, base):
    """Counter-based hash PRNG -> 24-bit uniform ints (pure VPU integer ops, portable)."""
    r = lax.broadcasted_iota(jnp.int32, shape, 0)
    c = lax.broadcasted_iota(jnp.int32, shape, 1)
    x = base + r * jnp.int32(shape[1]) + c
    x = x ^ _rshift_logical(x, 16)
    x = x * _i32(0x7FEB352D)
    x = x ^ _rshift_logical(x, 15)
    x = x * _i32(0x846CA68B)
    x = x ^ _rshift_logical(x, 16)
    return jnp.bitwise_and(x, jnp.int32(0x00FFFFFF))


def _make_kernel(apply_dropout: bool, keep_prob: float):
    """Fused 6-layer variational MLP forward (6 bf16 matmuls + leaky_relu + MC dropout)."""
    inv_keep = 1.0 / keep_prob if keep_prob > 0.0 else 1.0
    thr = int(round(keep_prob * (1 << 24)))   # integer keep-threshold (24-bit granularity)

    def kernel(seed_ref, x_ref, ws_ref, bs_ref, out_ref):
        pid = pl.program_id(0)

        def dropout(d, salt):
            if not apply_dropout:
                return d
            # distinct stream per (call-seed, batch tile, dropout site); hash decorrelates
            base = (seed_ref[0] * _i32(0x9E3779B1)
                    + pid * _i32(0x85EBCA77)
                    + jnp.int32(salt) * _i32(0xC2B2AE3D))
            u = _hash24(d.shape, base)
            keep = u < jnp.int32(thr)
            return d * jnp.where(keep, jnp.float32(inv_keep), jnp.float32(0.0))

        def layer(d, i, act=True):
            # bf16 MXU operands, f32 accumulation; bias add + leaky in f32 on the VPU
            y = jnp.dot(d.astype(jnp.bfloat16), ws_ref[i],
                        preferred_element_type=jnp.float32) + bs_ref[i:i + 1, :]
            return jnp.maximum(y, LEAK * y) if act else y

        d = x_ref[...]
        d = layer(d, 0)
        d = layer(d, 1)
        d = layer(d, 2)
        d = layer(d, 3)
        d = dropout(d, 1)                    # MC dropout after layer4
        d = layer(d, 4)
        d = dropout(d, 2)                    # MC dropout after layer5
        out_ref[...] = layer(d, 5, act=False)

    return kernel


def _pad2(a, rows, cols):
    return jnp.pad(a, ((0, rows - a.shape[0]), (0, cols - a.shape[1])))


def _pick_tm(m128):
    # Larger batch tiles amortize the ~0.35 us per-grid-step overhead, but keep >=2 grid
    # steps when the batch allows so the "parallel" axis spans both v7x TensorCores.
    for tm in (512, 256, 128):
        if m128 >= 2 * tm:
            return tm
    return 128


def vi_sparse_measure_forward(x, params, *, p_mc_dropout=0.5, stochastic=True, seed=0):
    """params: list of 6 (W, b) with W:(in,out), b:(1,out) already sampled (one forward() draw)."""
    assert len(params) == NUM_LAYERS
    batch, _ = x.shape
    out_features = params[-1][0].shape[1]

    m128 = pl.cdiv(batch, 128) * 128
    tm = _pick_tm(m128)
    m_pad = pl.cdiv(batch, tm) * tm

    x_p = _pad2(x.astype(jnp.float32), m_pad, LANE)

    # pack all weights / biases into single VMEM-resident arrays (3 input refs total)
    w_stack = jnp.stack([_pad2(w.astype(jnp.float32), LANE, LANE).astype(jnp.bfloat16)
                         for (w, _) in params])                                # (6,128,128) bf16
    b_rows = [jnp.pad(b.reshape(-1).astype(jnp.float32), (0, LANE - b.shape[-1]))
              for (_, b) in params]
    b_stack = jnp.pad(jnp.stack(b_rows), ((0, 8 - NUM_LAYERS), (0, 0)))        # (8,128) f32

    apply_dropout = bool(stochastic) and (p_mc_dropout is not None) and p_mc_dropout > 0.0
    keep_prob = 1.0 - (p_mc_dropout if p_mc_dropout is not None else 0.0)
    kernel = _make_kernel(apply_dropout, keep_prob)

    act_spec = pl.BlockSpec((tm, LANE), lambda i, s: (i, 0))
    w_spec = pl.BlockSpec((NUM_LAYERS, LANE, LANE), lambda i, s: (0, 0, 0))    # constant -> resident
    b_spec = pl.BlockSpec((8, LANE), lambda i, s: (0, 0))                      # constant -> resident

    flops = 2 * m_pad * LANE * LANE * NUM_LAYERS
    bytes_accessed = (x_p.size * 4 + int(w_stack.size) * 2 + int(b_stack.size) * 4
                      + m_pad * LANE * 4)

    out = pl.pallas_call(
        kernel,
        out_shape=jax.ShapeDtypeStruct((m_pad, LANE), jnp.float32),
        grid_spec=pltpu.PrefetchScalarGridSpec(
            num_scalar_prefetch=1,
            grid=(m_pad // tm,),
            in_specs=[act_spec, w_spec, b_spec],
            out_specs=pl.BlockSpec((tm, LANE), lambda i, s: (i, 0)),
        ),
        compiler_params=pltpu.CompilerParams(dimension_semantics=("parallel",)),
        cost_estimate=pl.CostEstimate(flops=int(flops), transcendentals=0,
                                      bytes_accessed=int(bytes_accessed)),
    )(jnp.asarray([seed], jnp.int32), x_p, w_stack, b_stack)

    return out[:batch, :out_features]


def build_params(key, input_size=9, output_size=9, weight_sigma=1.0, bias_sigma=10.0,
                 p_mc_dropout=0.5, init_prior_sigma_scale=0.01, stochastic=True):
    """Deterministic parameter construction mirroring the PyTorch __init__ + sampleTransform."""
    # TODO(synk): the VIModule KL / L2 loss terms (evalAllLosses) are not implemented; only the
    # forward pass is. Per-forward re-sampling of layer5/6 weights (sampleTransform) happens here
    # in the JAX wrapper rather than inside the kernel.
    incr = 1
    if p_mc_dropout is not None:
        incr = 10 if 1 - p_mc_dropout <= 0.1 else int(1 / (1 - p_mc_dropout))
        incr = incr if incr != 0 else 1                     # == 2 for p=0.5

    dims = [input_size, 48, 24, 6, 12 * incr]               # layer1..layer4 (deterministic Linear)
    mfg_dims = [(12 * incr, 24 * incr), (24 * incr, output_size)]  # layer5, layer6 (sampled)

    keys = jax.random.split(key, 16)
    ki = iter(range(16))
    params = []

    # L2RegularizedLinear: W ~ U(-1/sqrt(in), 1/sqrt(in)), bias filled with 0.0
    for li in range(4):
        fan_in, fan_out = dims[li], dims[li + 1]
        bound = 1.0 / jnp.sqrt(fan_in)
        w = jax.random.uniform(keys[next(ki)], (fan_in, fan_out), jnp.float32, -bound, bound)
        b = jnp.zeros((1, fan_out), jnp.float32)
        params.append((w, b))

    # MeanFieldGaussianFeedForward: sample w = mean + exp(lsigma) * noise  (stochastic)
    for (fan_in, fan_out), prior_sigma_w, prior_sigma_b in [
            (mfg_dims[0], weight_sigma, bias_sigma),
            (mfg_dims[1], weight_sigma, bias_sigma)]:
        w_mean = jax.random.uniform(keys[next(ki)], (fan_out, fan_in), jnp.float32) - 0.5
        lw_sigma = jnp.full((fan_out, fan_in), jnp.log(init_prior_sigma_scale * prior_sigma_w),
                            jnp.float32)
        w_noise = jax.random.normal(keys[next(ki)], (fan_out, fan_in), jnp.float32)
        w_sample = w_mean + (jnp.exp(lw_sigma) * w_noise if stochastic else 0.0)

        b_mean = jax.random.uniform(keys[next(ki)], (fan_out,), jnp.float32) - 0.5
        lb_sigma = jnp.full((fan_out,), jnp.log(init_prior_sigma_scale * prior_sigma_b), jnp.float32)
        b_noise = jax.random.normal(keys[next(ki)], (fan_out,), jnp.float32)
        b_sample = b_mean + (jnp.exp(lb_sigma) * b_noise if stochastic else 0.0)

        params.append((w_sample.T, b_sample.reshape(1, fan_out)))  # store as (in,out), (1,out)

    return params, incr


if __name__ == "__main__":
    key = jax.random.PRNGKey(0)
    k_x, k_params = jax.random.split(key)

    # batch folds many MC inputs into one call (multiple of 128 -> 2 grid tiles here)
    batch, input_size, output_size = 256, 9, 9
    x = jax.random.normal(k_x, (batch, input_size), jnp.float32)
    params, incr = build_params(k_params, input_size=input_size, output_size=output_size)

    # 1) deterministic path (dropout off): check against a plain-JAX reference that uses the
    #    same numerics as the kernel (bf16 matmul operands, f32 accumulation, f32 elementwise).
    out_det = vi_sparse_measure_forward(x, params, stochastic=False)
    jax.block_until_ready(out_det)

    def ref(x, params):
        d = x
        for i, (w, b) in enumerate(params):
            d = jnp.dot(d.astype(jnp.bfloat16), w.astype(jnp.bfloat16),
                        preferred_element_type=jnp.float32) + b
            if i < NUM_LAYERS - 1:
                d = jnp.maximum(d, LEAK * d)
        return d

    expected = ref(x, params)
    assert out_det.shape == (batch, output_size)
    max_err = float(jnp.max(jnp.abs(out_det - expected)))
    assert jnp.allclose(out_det, expected, atol=5e-3, rtol=5e-3), max_err

    # 2) stochastic MC-dropout path (masks drawn in-kernel with the counter-hash PRNG)
    out_mc = vi_sparse_measure_forward(x, params, stochastic=True, seed=1234)
    jax.block_until_ready(out_mc)
    assert out_mc.shape == (batch, output_size)
    assert bool(jnp.all(jnp.isfinite(out_mc)))

    print("KERNEL_OK")
</pallas_src>

<mosaic_0001>
module attributes {stable_mosaic.version = 11 : i64} {
  func.func @kernel(%arg0: i32, %arg1: memref<1xi32, #tpu.memory_space<smem>>, %arg2: memref<128x128xf32, #tpu.memory_space<vmem>>, %arg3: memref<6x128x128xbf16, #tpu.memory_space<vmem>>, %arg4: memref<8x128xf32, #tpu.memory_space<vmem>>, %arg5: memref<128x128xf32, #tpu.memory_space<vmem>>) attributes {dimension_semantics = [#tpu.dimension_semantics<parallel>], iteration_bounds = array<i64: 2>, scalar_prefetch = 1 : i64, scratch_operands = 0 : i64, tpu.core_type = #tpu.core_type<tc>, window_params = [{transform_indices = @transform_0, window_bounds = array<i64: 128, 128>}, {pipeline_mode = #tpu.pipeline_mode<synchronous>, transform_indices = @transform_1, window_bounds = array<i64: 6, 128, 128>}, {pipeline_mode = #tpu.pipeline_mode<synchronous>, transform_indices = @transform_2, window_bounds = array<i64: 8, 128>}, {transform_indices = @transform_3, window_bounds = array<i64: 128, 128>}]} {
    %c0 = arith.constant 0 : index
    %c0_0 = arith.constant 0 : index
    %0 = vector.load %arg2[%c0, %c0_0] : memref<128x128xf32, #tpu.memory_space<vmem>>, vector<128x128xf32>
    %1 = arith.truncf %0 : vector<128x128xf32> to vector<128x128xbf16>
    %c0_1 = arith.constant 0 : index
    %c0_2 = arith.constant 0 : index
    %c0_3 = arith.constant 0 : index
    %2 = vector.load %arg3[%c0_1, %c0_2, %c0_3] : memref<6x128x128xbf16, #tpu.memory_space<vmem>>, vector<1x128x128xbf16>
    %3 = vector.shape_cast %2 : vector<1x128x128xbf16> to vector<128x128xbf16>
    %cst = arith.constant dense<0.000000e+00> : vector<128x128xf32>
    %4 = tpu.matmul %1, %3, %cst {dimension_numbers = #tpu.dot_dimension_numbers<[1], [0], [0], [1], [0, 0, 1, 1], [], []>} : vector<128x128xbf16>, vector<128x128xbf16>, vector<128x128xf32> -> vector<128x128xf32>
    %c0_4 = arith.constant 0 : index
    %c0_5 = arith.constant 0 : index
    %5 = vector.load %arg4[%c0_4, %c0_5] : memref<8x128xf32, #tpu.memory_space<vmem>>, vector<1x128xf32>
    %6 = vector.broadcast %5 : vector<1x128xf32> to vector<128x128xf32>
    %7 = arith.addf %4, %6 : vector<128x128xf32>
    %cst_6 = arith.constant 0.00999999977 : f32
    %8 = vector.broadcast %cst_6 : f32 to vector<128x128xf32>
    %9 = arith.mulf %8, %7 : vector<128x128xf32>
    %10 = arith.maximumf %7, %9 : vector<128x128xf32>
    %11 = arith.truncf %10 : vector<128x128xf32> to vector<128x128xbf16>
    %c1 = arith.constant 1 : index
    %c0_7 = arith.constant 0 : index
    %c0_8 = arith.constant 0 : index
    %12 = vector.load %arg3[%c1, %c0_7, %c0_8] : memref<6x128x128xbf16, #tpu.memory_space<vmem>>, vector<1x128x128xbf16>
    %13 = vector.shape_cast %12 : vector<1x128x128xbf16> to vector<128x128xbf16>
    %cst_9 = arith.constant dense<0.000000e+00> : vector<128x128xf32>
    %14 = tpu.matmul %11, %13, %cst_9 {dimension_numbers = #tpu.dot_dimension_numbers<[1], [0], [0], [1], [0, 0, 1, 1], [], []>} : vector<128x128xbf16>, vector<128x128xbf16>, vector<128x128xf32> -> vector<128x128xf32>
    %c1_10 = arith.constant 1 : index
    %c0_11 = arith.constant 0 : index
    %15 = vector.load %arg4[%c1_10, %c0_11] : memref<8x128xf32, #tpu.memory_space<vmem>>, vector<1x128xf32>
    %16 = vector.broadcast %15 : vector<1x128xf32> to vector<128x128xf32>
    %17 = arith.addf %14, %16 : vector<128x128xf32>
    %cst_12 = arith.constant 0.00999999977 : f32
    %18 = vector.broadcast %cst_12 : f32 to vector<128x128xf32>
    %19 = arith.mulf %18, %17 : vector<128x128xf32>
    %20 = arith.maximumf %17, %19 : vector<128x128xf32>
    %21 = arith.truncf %20 : vector<128x128xf32> to vector<128x128xbf16>
    %c2 = arith.constant 2 : index
    %c0_13 = arith.constant 0 : index
    %c0_14 = arith.constant 0 : index
    %22 = vector.load %arg3[%c2, %c0_13, %c0_14] : memref<6x128x128xbf16, #tpu.memory_space<vmem>>, vector<1x128x128xbf16>
    %23 = vector.shape_cast %22 : vector<1x128x128xbf16> to vector<128x128xbf16>
    %cst_15 = arith.constant dense<0.000000e+00> : vector<128x128xf32>
    %24 = tpu.matmul %21, %23, %cst_15 {dimension_numbers = #tpu.dot_dimension_numbers<[1], [0], [0], [1], [0, 0, 1, 1], [], []>} : vector<128x128xbf16>, vector<128x128xbf16>, vector<128x128xf32> -> vector<128x128xf32>
    %c2_16 = arith.constant 2 : index
    %c0_17 = arith.constant 0 : index
    %25 = vector.load %arg4[%c2_16, %c0_17] : memref<8x128xf32, #tpu.memory_space<vmem>>, vector<1x128xf32>
    %26 = vector.broadcast %25 : vector<1x128xf32> to vector<128x128xf32>
    %27 = arith.addf %24, %26 : vector<128x128xf32>
    %cst_18 = arith.constant 0.00999999977 : f32
    %28 = vector.broadcast %cst_18 : f32 to vector<128x128xf32>
    %29 = arith.mulf %28, %27 : vector<128x128xf32>
    %30 = arith.maximumf %27, %29 : vector<128x128xf32>
    %31 = arith.truncf %30 : vector<128x128xf32> to vector<128x128xbf16>
    %c3 = arith.constant 3 : index
    %c0_19 = arith.constant 0 : index
    %c0_20 = arith.constant 0 : index
    %32 = vector.load %arg3[%c3, %c0_19, %c0_20] : memref<6x128x128xbf16, #tpu.memory_space<vmem>>, vector<1x128x128xbf16>
    %33 = vector.shape_cast %32 : vector<1x128x128xbf16> to vector<128x128xbf16>
    %cst_21 = arith.constant dense<0.000000e+00> : vector<128x128xf32>
    %34 = tpu.matmul %31, %33, %cst_21 {dimension_numbers = #tpu.dot_dimension_numbers<[1], [0], [0], [1], [0, 0, 1, 1], [], []>} : vector<128x128xbf16>, vector<128x128xbf16>, vector<128x128xf32> -> vector<128x128xf32>
    %c3_22 = arith.constant 3 : index
    %c0_23 = arith.constant 0 : index
    %35 = vector.load %arg4[%c3_22, %c0_23] : memref<8x128xf32, #tpu.memory_space<vmem>>, vector<1x128xf32>
    %36 = vector.broadcast %35 : vector<1x128xf32> to vector<128x128xf32>
    %37 = arith.addf %34, %36 : vector<128x128xf32>
    %cst_24 = arith.constant 0.00999999977 : f32
    %38 = vector.broadcast %cst_24 : f32 to vector<128x128xf32>
    %39 = arith.mulf %38, %37 : vector<128x128xf32>
    %40 = arith.maximumf %37, %39 : vector<128x128xf32>
    %41 = arith.truncf %40 : vector<128x128xf32> to vector<128x128xbf16>
    %c4 = arith.constant 4 : index
    %c0_25 = arith.constant 0 : index
    %c0_26 = arith.constant 0 : index
    %42 = vector.load %arg3[%c4, %c0_25, %c0_26] : memref<6x128x128xbf16, #tpu.memory_space<vmem>>, vector<1x128x128xbf16>
    %43 = vector.shape_cast %42 : vector<1x128x128xbf16> to vector<128x128xbf16>
    %cst_27 = arith.constant dense<0.000000e+00> : vector<128x128xf32>
    %44 = tpu.matmul %41, %43, %cst_27 {dimension_numbers = #tpu.dot_dimension_numbers<[1], [0], [0], [1], [0, 0, 1, 1], [], []>} : vector<128x128xbf16>, vector<128x128xbf16>, vector<128x128xf32> -> vector<128x128xf32>
    %c4_28 = arith.constant 4 : index
    %c0_29 = arith.constant 0 : index
    %45 = vector.load %arg4[%c4_28, %c0_29] : memref<8x128xf32, #tpu.memory_space<vmem>>, vector<1x128xf32>
    %46 = vector.broadcast %45 : vector<1x128xf32> to vector<128x128xf32>
    %47 = arith.addf %44, %46 : vector<128x128xf32>
    %cst_30 = arith.constant 0.00999999977 : f32
    %48 = vector.broadcast %cst_30 : f32 to vector<128x128xf32>
    %49 = arith.mulf %48, %47 : vector<128x128xf32>
    %50 = arith.maximumf %47, %49 : vector<128x128xf32>
    %51 = arith.truncf %50 : vector<128x128xf32> to vector<128x128xbf16>
    %c5 = arith.constant 5 : index
    %c0_31 = arith.constant 0 : index
    %c0_32 = arith.constant 0 : index
    %52 = vector.load %arg3[%c5, %c0_31, %c0_32] : memref<6x128x128xbf16, #tpu.memory_space<vmem>>, vector<1x128x128xbf16>
    %53 = vector.shape_cast %52 : vector<1x128x128xbf16> to vector<128x128xbf16>
    %cst_33 = arith.constant dense<0.000000e+00> : vector<128x128xf32>
    %54 = tpu.matmul %51, %53, %cst_33 {dimension_numbers = #tpu.dot_dimension_numbers<[1], [0], [0], [1], [0, 0, 1, 1], [], []>} : vector<128x128xbf16>, vector<128x128xbf16>, vector<128x128xf32> -> vector<128x128xf32>
    %c5_34 = arith.constant 5 : index
    %c0_35 = arith.constant 0 : index
    %55 = vector.load %arg4[%c5_34, %c0_35] : memref<8x128xf32, #tpu.memory_space<vmem>>, vector<1x128xf32>
    %56 = vector.broadcast %55 : vector<1x128xf32> to vector<128x128xf32>
    %57 = arith.addf %54, %56 : vector<128x128xf32>
    %c0_36 = arith.constant 0 : index
    %c0_37 = arith.constant 0 : index
    %58 = vector.load %arg5[%c0_36, %c0_37] : memref<128x128xf32, #tpu.memory_space<vmem>>, vector<128x128xf32>
    tpu.vector_store %arg5[%c0_36, %c0_37], %57 {strides = array<i32>} : memref<128x128xf32, #tpu.memory_space<vmem>>, vector<128x128xf32>,
    return
  }
  func.func @transform_0(%arg0: i32, %arg1: memref<1xi32, #tpu.memory_space<smem>>) -> (i32, i32) {
    %c0_i32 = arith.constant 0 : i32
    %c0_i32_0 = arith.constant 0 : i32
    return %arg0, %c0_i32 : i32, i32
  }
  func.func @transform_1(%arg0: i32, %arg1: memref<1xi32, #tpu.memory_space<smem>>) -> (i32, i32, i32) {
    %c0_i32 = arith.constant 0 : i32
    %c0_i32_0 = arith.constant 0 : i32
    %c0_i32_1 = arith.constant 0 : i32
    %c0_i32_2 = arith.constant 0 : i32
    return %c0_i32, %c0_i32_0, %c0_i32_1 : i32, i32, i32
  }
  func.func @transform_2(%arg0: i32, %arg1: memref<1xi32, #tpu.memory_space<smem>>) -> (i32, i32) {
    %c0_i32 = arith.constant 0 : i32
    %c0_i32_0 = arith.constant 0 : i32
    %c0_i32_1 = arith.constant 0 : i32
    return %c0_i32, %c0_i32_0 : i32, i32
  }
  func.func @transform_3(%arg0: i32, %arg1: memref<1xi32, #tpu.memory_space<smem>>) -> (i32, i32) {
    %c0_i32 = arith.constant 0 : i32
    %c0_i32_0 = arith.constant 0 : i32
    return %arg0, %c0_i32 : i32, i32
  }
}

</mosaic_0001>

<bundles_post_ra>
// kernel: tpu_custom_call.1
= control target key start
LH: loop header
LB: loop body
LE: loop exit
PB: predicated region body
PF: predicated region fallthrough
CT: control target
= control target key end

     0   :  { %10 = vsyncpa [#allocation5], 0  ;;  %s2555_s0 = inlined_call_operand.<no memory space> [shape: s32[1], index: 0, kind: input, shape index: {}]   ;;  %s2556_s1 = inlined_call_operand.hbm [shape: f32[256,128], index: 1, kind: input, shape index: {}]   ;;  %s2557_s2 = inlined_call_operand.hbm [shape: bf16[6,128,128], index: 2, kind: input, shape index: {}]   ;;  %s2558_s3 = inlined_call_operand.hbm [shape: f32[8,128], index: 3, kind: input, shape index: {}]   ;;  %s2559_s4 = inlined_call_operand.hbm [shape: f32[256,128], index: 4, kind: output, shape index: {}]  }
   0x1   :  { %12 = vsyncpa [#allocation5 + $0x1], 0 }
   0x2   :  { %13 = vsyncpa [#allocation8], 0 }
   0x3   :  { %14 = vsyncpa [#allocation6], 0 }
   0x4   :  { %16 = vsyncpa [#allocation6 + $0x1], 0  ;;  %s2236_s15 = smov 0   ;;  %s2238_s0 = smov 0  }
   0x5   :  { %s2240_s16 = smov 0   ;;  %s2242_s17 = smov 0  }
   0x6 LB: > { %s2257_s18 = sadd.s32 4294967295, %s2199_s17   ;;  %s1568_s19 = sadd.s32 4294967294, %s2199_s17   ;;  %s2199_s17 = sphi %s2242_s17, %s2581_s17   ;;  %s2195_s16 = sphi %s2240_s16, %s2580_s16   ;;  %s2191_s0 = sphi %s2238_s0, %s2579_s0   ;;  %s2187_s15 = sphi %s2236_s15, %s2578_s15  }
   0x7   : > { %p42_p0 = scmp.ne.s32.totalorder %s2191_s0, %s2187_s15  ;;  %p2560_p1 = scmp.eq.s32.totalorder %s2257_s18, 0 }
   0x8   : > { %p114_p3 = scmp.eq.s32.totalorder %s1568_s19, 1  ;;  %p1569_p5 = scmp.ge.s32.totalorder %s2199_s17, 1 }
   0x9   : > { %p2266_p4 = por %p2560_p1, %p42_p0  ;;  %p121_p7 = scmp.lt.s32.totalorder %s2199_s17, 3 }
   0xa   : > { %p2271_p6 = por %p114_p3, %p42_p0  ;;  %s2201_s23 = smov [#allocation7]  }
   0xb   : > { %s2564_s20 = scalar_select %p2266_p4, 1, 0 }
   0xc   : > { %s2565_s21 = scalar_select %p2271_p6, 1, 0 }
   0xd   : > { %p2276_p8 = pnand %p1569_p5, %p121_p7  ;;  %s133_s24 = sshll.u32 %s2201_s23, 4  ;;  %s134_s24 = int_to_ptr.vmem [resolvable:$true] %s133_s24 }
   0xe   : > { %s2202_s26 = smov [#allocation9]   ;;  %s2062_s28 = scalar_lea.vmem %s134_s24, 6144 }
   0xf   : > { %s2566_s22 = scalar_select %p2276_p8, 1, 0 }
  0x10   : > { %p1942_p9 = pneg %p2276_p8  ;;  %s147_s27 = sshll.u32 %s2202_s26, 4  ;;  %s148_s27 = int_to_ptr.vmem [resolvable:$true] %s147_s27 }
  0x11   : > { %p2063_p13 = scmp.ne.s32.totalorder %s134_s24, %s2062_s28  ;;  %p2070_p5 = scmp.lt.s32.totalorder %s134_s24, %s134_s24 }
  0x12   : > { %p2285_p11 = pnand %p1942_p9, %p2560_p1  ;;  %p2071_p7 = scmp.lt.s32.totalorder %s2062_s28, %s2062_s28 }
  0x14   : > { %p2053_p12 = pneg %p2285_p11  ;;  %p2072_p10 = por %p2071_p7, %p2070_p5 }
  0x16   : > { %p2065_p0 = pnand %p2063_p13, %p2053_p12 }
  0x18   : > { %p2066_p3 = pneg %p2065_p0 }
  0x1a   : > { %p2073_p9 = pnand %p2072_p10, %p2066_p3 }
  0x1c   : > { %2076 = shalt.err (!%p2073_p9)
}
  0x1d   : > { %s2203_s29 = smov 64   ;;  %s2204_s30 = smov 4  }
  0x1e   : > { %1945 = dma.hbm_to_vmem [thread:$0]  (!%p2285_p11), %s2557_s2, 6144, %s134_s24, [#allocation8], %s2203_s29, %s2203_s29, %s2204_s30  }
  0x1f   : > { %s2088_s7 = scalar_lea.vmem %s148_s27, 128  ;;  %p2096_p2 = scmp.lt.s32.totalorder %s148_s27, %s148_s27 }
  0x20   : > { %p2089_p1 = scmp.ne.s32.totalorder %s148_s27, %s2088_s7  ;;  %p2097_p6 = scmp.lt.s32.totalorder %s2088_s7, %s2088_s7 }
  0x22   : > { %p2091_p13 = pnand %p2089_p1, %p2053_p12  ;;  %p2098_p5 = por %p2097_p6, %p2096_p2 }
  0x24   : > { %p2092_p0 = pneg %p2091_p13 }
  0x26   : > { %p2099_p10 = pnand %p2098_p5, %p2092_p0 }
  0x28   : > { %2102 = shalt.err (!%p2099_p10)
}
  0x29   : > { %1948 = dma.hbm_to_vmem [thread:$0]  (!%p2285_p11), %s2558_s3, 128, %s148_s27, [#allocation8]  }
  0x2a   : > { %s2308_s10 = sadd.s32 1, %s2199_s17   ;;  %s29_s11 = sadd.s32 1, %s2195_s16 }
  0x2b   : > { %s26_s12 = ssub.s32 %s2199_s17, %s2308_s10  ;;  %p36_p1 = scmp.ne.s32.totalorder %s2195_s16, %s2191_s0 }
  0x2c   : > { %p27_p2 = scmp.eq.s32.totalorder %s26_s12, 0  ;;  %p37_p6 = scmp.eq.s32.totalorder %s2199_s17, 0 }
  0x2d   : > { %p2568_p12 = scmp.eq.s32.totalorder %s2257_s18, 1  ;;  %p1959_p7 = scmp.lt.s32.totalorder %s2199_s17, 2 }
  0x2e   : > { %s2324_s14 = scalar_select %p27_p2, %s2195_s16, %s29_s11  }
  0x2f   : > { %p2318_p3 = por %p2568_p12, %p36_p1  ;;  %p38_p9 = por %p37_p6, %p36_p1 }
  0x30   : > { %s158_s19 = sand.u32 1, %s2195_s16   ;;  %s1640_s24 = sshll.u32 %s2199_s17, 11 }
  0x31   : > { %s2569_s13 = scalar_select %p2318_p3, 1, 0 }
  0x32   : > { %s1573_s23 = sshll.u32 %s158_s19, 7  ;;  %s2331_s27 = scalar_lea.hbm %s2556_s1, %s1640_s24 }
  0x33   : > { %s162_s28 = scalar_lea.vmem [#allocation4], %s1573_s23  ;;  %p2335_p11 = pnand %p1959_p7, %p38_p9 }
  0x34   : > { %s169_s29 = sshll.u32 %s162_s28, 4  ;;  %s2339_s5 = scalar_lea.sflag [#allocation5], %s158_s19  ;;  %s2333_s29 = int_to_ptr.vmem [resolvable:$true] %s169_s29 }
  0x35   : > { %s2103_s6 = scalar_lea.hbm %s2331_s27, 2048  ;;  %p2105_p0 = pneg %p2335_p11 }
  0x36   : > { %p2104_p13 = scmp.ne.s32.totalorder %s2331_s27, %s2103_s6  ;;  %s2108_s9 = scalar_lea.hbm %s2556_s1, 4096 }
  0x37   : > { %p2109_p1 = scmp.lt.s32.totalorder %s2331_s27, %s2556_s1  ;;  %p2110_p2 = scmp.lt.s32.totalorder %s2108_s9, %s2103_s6 }
  0x38   : > { %p2106_p5 = pnand %p2105_p0, %p2104_p13 }
  0x39   : > { %p2111_p6 = por %p2110_p2, %p2109_p1 }
  0x3a   : > { %p2107_p10 = pneg %p2106_p5 }
  0x3c   : > { %p2112_p12 = pnand %p2111_p6, %p2107_p10 }
  0x3e   : > { %2115 = shalt.err (!%p2112_p12)
}
  0x3f   : > { %s2116_s19 = scalar_lea.vmem %s2333_s29, 2048  ;;  %s2205_s23 = smov [#allocation4]  }
  0x40   : > { %p2117_p7 = scmp.ne.s32.totalorder %s2333_s29, %s2116_s19  ;;  %s2121_s24 = sshll.u32 %s2205_s23, 4  ;;  %s2122_s24 = int_to_ptr.vmem [resolvable:$false] %s2121_s24 }
  0x41   : > { %s2123_s25 = scalar_lea.vmem %s2122_s24, 4096  ;;  %p2124_p5 = scmp.lt.s32.totalorder %s2333_s29, %s2122_s24 }
  0x42   : > { %p2119_p9 = pnand %p2117_p7, %p2105_p0  ;;  %p2125_p3 = scmp.lt.s32.totalorder %s2123_s25, %s2116_s19 }
  0x44   : > { %p2120_p13 = pneg %p2119_p9  ;;  %p2126_p4 = por %p2125_p3, %p2124_p5 }
  0x46   : > { %p2127_p8 = pnand %p2126_p4, %p2120_p13 }
  0x48   : > { %2130 = shalt.err (!%p2127_p8)
}
  0x49   : > { %s2206_s26 = smov 128   ;;  %s2207_s28 = smov 8  }
  0x4a   : > { %1952 = dma.hbm_to_vmem [thread:$0]  (!%p2335_p11), %s2331_s27, 2048, %s2333_s29, %s2339_s5, %s2206_s26, %s2206_s26, %s2207_s28  }
  0x4b   : > { %p2571_p0 = scmp.ne.s32.totalorder %s2566_s22, 0 }
  0x4c   : > { %s2363_s6 = sand.u32 (!%p2571_p0), 1, %s2191_s0   ;;  %p2572_p4 = scmp.ne.s32.totalorder (!%p2571_p0), %s2564_s20, 0 }
  0x4d   : > { %181 = sbr.rel (%p2571_p0) target bundleno = 1398 (0x576), region = 32  ;;  %s1577_s7 = sshll.u32 (!%p2571_p0), %s2363_s6, 7 }
  0x4e   : > { %s184_s8 = scalar_lea.sflag (!%p2571_p0), [#allocation5], %s2363_s6  ;;  %s2369_s9 = scalar_lea.vmem (!%p2571_p0), [#allocation4], %s1577_s7 }
  0x52   : > { %2174 = dma.done.wait (%p2572_p4), %s184_s8, 2048  }
  0x53   : > { %2176 = vsyncadd (%p2572_p4), %s184_s8, 4294965248  ;;  %p2573_p8 = scmp.eq.s32.totalorder %s2257_s18, 0 }
  0x55   : > { %2178 = dma.done.wait (%p2573_p8), [#allocation8], 6272   ;;  %p2574_p3 = pmov %p2573_p8 }
  0x56   : > { %v2003_v0 = vld [vmem:[#allocation7 + $0x38] sm:$0xff]   ;;  %v2004_v1 = vld [vmem:[#allocation7 + $0x30] sm:$0xff]   ;;  %v2005_v2 = vld [vmem:[#allocation7 + $0x28] sm:$0xff]   ;;  %s2487_s20 = scalar_lea.vmem [#allocation10], %s1577_s7  ;;  %s1641_s22 = sshll.u32 %s2257_s18, 11 }
  0x57   : > { %2180 = vsyncadd (%p2574_p3), [#allocation8], 4294961024  ;;  %1738 = vmatprep.subr.bf16.mxu0 %v2003_v0  ;;  %v2006_v3 = vld [vmem:[#allocation7 + $0x20] sm:$0xff]   ;;  %v222_v5 = vld [vmem:[%s2369_s9 + $0x8] sm:$0xff]  ;;  %s1476_s27 = sshll.u32 %s2487_s20, 4  ;;  %s2508_s5 = scalar_lea.hbm %s2559_s4, %s1641_s22  ;;  %s2510_s27 = int_to_ptr.vmem [resolvable:$true] %s1476_s27 }
  0x58   : > { %1739 = vmatpush3.bf16.msra.mxu0 %v2003_v0  ;;  %v221_v4 = vld [vmem:[%s2369_s9] sm:$0xff]  ;;  %v2007_v7 = vld [vmem:[#allocation7 + $0x18] sm:$0xff]   ;;  %v2012_v9 = vld [vmem:[#allocation7 + $0x70] sm:$0xff]   ;;  %s1463_s11 = scalar_lea.sflag [#allocation6], %s2363_s6  ;;  %s2131_s18 = scalar_lea.vmem %s2510_s27, 2048 }
  0x59   : > { %1740 = vmatprep.subr.bf16.mxu0 %v2004_v1  ;;  %v237_v6 = vpack.c.bf16 %v222_v5, %v221_v4  ;;  %v2011_v8 = vld [vmem:[#allocation7 + $0x78] sm:$0xff]   ;;  %v2008_v10 = vld [vmem:[#allocation7 + $0x10] sm:$0xff]   ;;  %v2013_v11 = vld [vmem:[#allocation7 + $0x68] sm:$0xff]   ;;  %p2132_p11 = scmp.ne.s32.totalorder %s2510_s27, %s2131_s18  ;;  %p2575_p10 = scmp.ne.s32.totalorder %s2569_s13, 0 }
  0x5a   : > { %1770 = vmatprep.subr.bf16.mxu1 %v2011_v8  ;;  %v2009_v12 = vld [vmem:[#allocation7 + $0x8] sm:$0xff]   ;;  %v2014_v13 = vld [vmem:[#allocation7 + $0x60] sm:$0xff]   ;;  %v223_v15 = vld [vmem:[%s2369_s9 + $0x10] sm:$0xff]  ;;  %s2208_s12 = smov [#allocation10]  }
  0x5b   : > { %1754 = vmatprep.mubr.bf16.mxu0 %v237_v6  ;;  %1771 = vmatpush3.bf16.msra.mxu1 %v2011_v8  ;;  %v2010_v14 = vld [vmem:[#allocation7] sm:$0xff]   ;;  %v224_v16 = vld [vmem:[%s2369_s9 + $0x18] sm:$0xff]  ;;  %v226_v18 = vld [vmem:[%s2369_s9 + $0x28] sm:$0xff]  ;;  %p2133_p1 = pnand %p2132_p11, %p2575_p10  ;;  %s2135_s19 = sshll.u32 %s2208_s12, 4  ;;  %s2136_s19 = int_to_ptr.vmem [resolvable:$false] %s2135_s19 }
  0x5c   : > { %1741 = vmatpush3.bf16.msra.mxu0 %v2004_v1  ;;  %1772 = vmatprep.subr.bf16.mxu1 %v2012_v9  ;;  %v225_v17 = vld [vmem:[%s2369_s9 + $0x20] sm:$0xff]  ;;  %v238_v19 = vpack.c.bf16 %v224_v16, %v223_v15  ;;  %v227_v21 = vld [vmem:[%s2369_s9 + $0x30] sm:$0xff]  ;;  %v228_v22 = vld [vmem:[%s2369_s9 + $0x38] sm:$0xff]  ;;  %s2137_s23 = scalar_lea.vmem %s2136_s19, 4096  ;;  %p2138_p6 = scmp.lt.s32.totalorder %s2510_s27, %s2136_s19 }
  0x5d   : > { %1742 = vmatprep.subr.bf16.mxu0 %v2005_v2  ;;  %v239_v20 = vpack.c.bf16 %v226_v18, %v225_v17  ;;  %v229_v23 = vld [vmem:[%s2369_s9 + $0x40] sm:$0xff]  ;;  %v230_v24 = vld [vmem:[%s2369_s9 + $0x48] sm:$0xff]  ;;  %v240_v25 = vpack.c.bf16 %v228_v22, %v227_v21  ;;  %v231_v27 = vld [vmem:[%s2369_s9 + $0x50] sm:$0xff]  ;;  %p2134_p2 = pneg %p2133_p1  ;;  %p2139_p12 = scmp.lt.s32.totalorder %s2137_s23, %s2131_s18 }
  0x5e   : > { %v241_v26 = vpack.c.bf16 %v230_v24, %v229_v23  ;;  %v232_v28 = vld [vmem:[%s2369_s9 + $0x58] sm:$0xff]  ;;  %v233_v29 = vld [vmem:[%s2369_s9 + $0x60] sm:$0xff]  ;;  %v234_v30 = vld [vmem:[%s2369_s9 + $0x68] sm:$0xff] }
  0x5f   : > { %1773 = vmatpush3.bf16.msra.mxu1 %v2012_v9  ;;  %v242_v31 = vpack.c.bf16 %v232_v28, %v231_v27  ;;  %v243_v32 = vpack.c.bf16 %v234_v30, %v233_v29  ;;  %v235_v33 = vld [vmem:[%s2369_s9 + $0x70] sm:$0xff]  ;;  %v236_v34 = vld [vmem:[%s2369_s9 + $0x78] sm:$0xff]  ;;  %v2017_v38 = vld [vmem:[#allocation7 + $0x48] sm:$0xff]   ;;  %p2140_p7 = por %p2139_p12, %p2138_p6 }
  0x60   : > { %1743 = vmatpush3.bf16.msra.mxu0 %v2005_v2  ;;  %1774 = vmatprep.subr.bf16.mxu1 %v2013_v11  ;;  %v244_v35 = vpack.c.bf16 %v236_v34, %v235_v33  ;;  %v2015_v36 = vld [vmem:[#allocation7 + $0x58] sm:$0xff]   ;;  %v2016_v37 = vld [vmem:[#allocation7 + $0x50] sm:$0xff]   ;;  %v2018_v39 = vld [vmem:[#allocation7 + $0x40] sm:$0xff]  }
  0x61   : > { %1744 = vmatprep.subr.bf16.mxu0 %v2006_v3  ;;  %v2019_v40 = vld [vmem:[#allocation7 + $0xb8] sm:$0xff]   ;;  %v2020_v41 = vld [vmem:[#allocation7 + $0xb0] sm:$0xff]   ;;  %v2021_v42 = vld [vmem:[#allocation7 + $0xa8] sm:$0xff]   ;;  %p2141_p9 = pnand %p2140_p7, %p2134_p2 }
  0x62   : > { %v2022_v43 = vld [vmem:[#allocation7 + $0xa0] sm:$0xff]   ;;  %v2023_v44 = vld [vmem:[#allocation7 + $0x98] sm:$0xff]  }
  0x63   : > { %1775 = vmatpush3.bf16.msra.mxu1 %v2013_v11  ;;  %v2395_v46 = vld [vmem:[#allocation9] ss:$0 sm:$0xff] }
  0x64   : > { %1745 = vmatpush3.bf16.msra.mxu0 %v2006_v3  ;;  %1776 = vmatprep.subr.bf16.mxu1 %v2014_v13 }
  0x65   : > { %1746 = vmatprep.subr.bf16.mxu0 %v2007_v7 }
  0x67   : > { %1777 = vmatpush3.bf16.msra.mxu1 %v2014_v13 }
  0x68   : > { %1747 = vmatpush3.bf16.msra.mxu0 %v2007_v7  ;;  %1778 = vmatprep.subr.bf16.mxu1 %v2015_v36 }
  0x69   : > { %1748 = vmatprep.subr.bf16.mxu0 %v2008_v10 }
  0x6b   : > { %1779 = vmatpush3.bf16.msra.mxu1 %v2015_v36 }
  0x6c   : > { %1749 = vmatpush3.bf16.msra.mxu0 %v2008_v10  ;;  %1780 = vmatprep.subr.bf16.mxu1 %v2016_v37 }
  0x6d   : > { %1750 = vmatprep.subr.bf16.mxu0 %v2009_v12 }
  0x6f   : > { %1781 = vmatpush3.bf16.msra.mxu1 %v2016_v37 }
  0x70   : > { %1751 = vmatpush3.bf16.msra.mxu0 %v2009_v12  ;;  %1782 = vmatprep.subr.bf16.mxu1 %v2017_v38 }
  0x71   : > { %1752 = vmatprep.subr.bf16.mxu0 %v2010_v14 }
  0x73   : > { %1783 = vmatpush3.bf16.msra.mxu1 %v2017_v38 }
  0x74   : > { %1753 = vmatpush3.bf16.msra.mxu0 %v2010_v14  ;;  %1784 = vmatprep.subr.bf16.mxu1 %v2018_v39 }
  0x75   : > { %1802 = vmatprep.subr.bf16.mxu0 %v2019_v40 }
  0x77   : > { %1755 = vmatmul.mubr.bf16.vlgmr.msra.gmra.mxu0 %v238_v19  ;;  %1785 = vmatpush3.bf16.msra.mxu1 %v2018_v39 }
  0x78   : > { %1758 = vmatprep.mubr.bf16.mxu0 %v239_v20  ;;  %1803 = vmatpush3.bf16.msra.mxu0 %v2019_v40 }
  0x79   : > { %1804 = vmatprep.subr.bf16.mxu0 %v2020_v41 }
  0x7c   : > { %1805 = vmatpush3.bf16.msra.mxu0 %v2020_v41 }
  0x7d   : > { %1806 = vmatprep.subr.bf16.mxu0 %v2021_v42 }
  0x7f   : > { %1759 = vmatmul.mubr.bf16.gmra.mxu0 %v240_v25 }
  0x80   : > { %1762 = vmatprep.mubr.bf16.mxu0 %v241_v26  ;;  %1807 = vmatpush3.bf16.msra.mxu0 %v2021_v42 }
  0x81   : > { %1808 = vmatprep.subr.bf16.mxu0 %v2022_v43 }
  0x84   : > { %1809 = vmatpush3.bf16.msra.mxu0 %v2022_v43 }
  0x85   : > { %1810 = vmatprep.subr.bf16.mxu0 %v2023_v44 }
  0x87   : > { %1763 = vmatmul.mubr.bf16.gmra.mxu0 %v242_v31 }
  0x88   : > { %1766 = vmatprep.mubr.bf16.mxu0 %v243_v32  ;;  %1811 = vmatpush3.bf16.msra.mxu0 %v2023_v44 }
  0x8f   : > { %1767 = vmatmul.mubr.bf16.gmra.mxu0 %v244_v35 }
 0x137   : > { %v1756_v45 = vpop.f32.mrf.mxu0 }
 0x138   : > { %v357_v49 = vadd.f32 %v1756_v45, %v2395_v46 }
 0x139   : > { %v348_v47 = vpop.f32.mrf.mxu0 }
 0x13a   : > { %v349_v48 = vadd.f32 %v2395_v46, %v348_v47  ;;  %v413_v56 = vmul.f32 0.01, %v357_v49 }
 0x13b   : > { %v1757_v50 = vpop.f32.mrf.mxu0 }
 0x13c   : > { %v360_v51 = vadd.f32 %v1757_v50, %v2395_v46  ;;  %v411_v53 = vmul.f32 0.01, %v349_v48  ;;  %v429_v0 = vmax.f32 %v357_v49, %v413_v56  ;;  %v2025_v56 = vld [vmem:[#allocation7 + $0x88] sm:$0xff]  }
 0x13d   : > { %v351_v52 = vpop.f32.mrf.mxu0 }
 0x13e   : > { %v414_v54 = vmul.f32 0.01, %v360_v51  ;;  %v352_v55 = vadd.f32 %v2395_v46, %v351_v52  ;;  %v427_v62 = vmax.f32 %v349_v48, %v411_v53 }
 0x13f   : > { %v1760_v57 = vpop.f32.mrf.mxu0 }
 0x140   : > { %v412_v58 = vmul.f32 0.01, %v352_v55  ;;  %v430_v59 = vmax.f32 %v360_v51, %v414_v54  ;;  %v373_v1 = vadd.f32 %v1760_v57, %v2395_v46  ;;  %v2026_v57 = vld [vmem:[#allocation7 + $0x80] sm:$0xff]  }
 0x141   : > { %v364_v60 = vpop.f32.mrf.mxu0 }
 0x142   : > { %v365_v61 = vadd.f32 %v2395_v46, %v364_v60  ;;  %v428_v63 = vmax.f32 %v352_v55, %v412_v58  ;;  %v444_v6 = vpack.c.bf16 %v430_v59, %v429_v0  ;;  %v417_v10 = vmul.f32 0.01, %v373_v1  ;;  %v2024_v55 = vld [vmem:[#allocation7 + $0x90] sm:$0xff]   ;;  %v2029_v59 = vld [vmem:[#allocation7 + $0xe8] sm:$0xff]   ;;  %v2030_v60 = vld [vmem:[#allocation7 + $0xe0] sm:$0xff]  }
 0x143   : > { %v1761_v2 = vpop.f32.mrf.mxu0  ;;  %1812 = vmatprep.subr.bf16.mxu0 %v2024_v55  ;;  %v2028_v58 = vld [vmem:[#allocation7 + $0xf0] sm:$0xff]  }
 0x144   : > { %v376_v3 = vadd.f32 %v1761_v2, %v2395_v46  ;;  %v443_v4 = vpack.c.bf16 %v428_v63, %v427_v62  ;;  %v415_v7 = vmul.f32 0.01, %v365_v61  ;;  %v433_v18 = vmax.f32 %v373_v1, %v417_v10  ;;  %1813 = vmatpush3.bf16.msra.mxu0 %v2024_v55  ;;  %v2413_v63 = vld [vmem:[#allocation9 + $0x1] ss:$0 sm:$0xff] }
 0x145   : > { %v367_v5 = vpop.f32.mrf.mxu0  ;;  %1814 = vmatprep.subr.bf16.mxu0 %v2025_v56 }
 0x146   : > { %v418_v8 = vmul.f32 0.01, %v376_v3  ;;  %v368_v9 = vadd.f32 %v2395_v46, %v367_v5  ;;  %1786 = vmatprep.mubr.bf16.mxu1 %v443_v4  ;;  %v431_v15 = vmax.f32 %v365_v61, %v415_v7  ;;  %v2031_v61 = vld [vmem:[#allocation7 + $0xd8] sm:$0xff]  }
 0x147   : > { %v1764_v11 = vpop.f32.mrf.mxu0  ;;  %1787 = vmatmul.mubr.bf16.vlgmr.msra.gmra.mxu1 %v444_v6 }
 0x148   : > { %v416_v12 = vmul.f32 0.01, %v368_v9  ;;  %v434_v13 = vmax.f32 %v376_v3, %v418_v8  ;;  %v389_v19 = vadd.f32 %v1764_v11, %v2395_v46  ;;  %1815 = vmatpush3.bf16.msra.mxu0 %v2025_v56 }
 0x149   : > { %v380_v14 = vpop.f32.mrf.mxu0  ;;  %1816 = vmatprep.subr.bf16.mxu0 %v2026_v57 }
 0x14a   : > { %v432_v16 = vmax.f32 %v368_v9, %v416_v12  ;;  %v381_v17 = vadd.f32 %v2395_v46, %v380_v14  ;;  %v446_v24 = vpack.c.bf16 %v434_v13, %v433_v18  ;;  %v421_v28 = vmul.f32 0.01, %v389_v19 }
 0x14b   : > { %v1765_v20 = vpop.f32.mrf.mxu0 }
 0x14c   : > { %v392_v21 = vadd.f32 %v1765_v20, %v2395_v46  ;;  %v445_v22 = vpack.c.bf16 %v432_v16, %v431_v15  ;;  %v419_v25 = vmul.f32 0.01, %v381_v17  ;;  %v437_v36 = vmax.f32 %v389_v19, %v421_v28  ;;  %1817 = vmatpush3.bf16.msra.mxu0 %v2026_v57 }
 0x14d   : > { %v383_v23 = vpop.f32.mrf.mxu0 }
 0x14e   : > { %v422_v26 = vmul.f32 0.01, %v392_v21  ;;  %v384_v27 = vadd.f32 %v2395_v46, %v383_v23  ;;  %1790 = vmatprep.mubr.bf16.mxu1 %v445_v22  ;;  %v435_v33 = vmax.f32 %v381_v17, %v419_v25 }
 0x14f   : > { %v1768_v29 = vpop.f32.mrf.mxu0  ;;  %1791 = vmatmul.mubr.bf16.gmra.mxu1 %v446_v24 }
 0x150   : > { %v420_v30 = vmul.f32 0.01, %v384_v27  ;;  %v438_v31 = vmax.f32 %v392_v21, %v422_v26  ;;  %v405_v37 = vadd.f32 %v1768_v29, %v2395_v46 }
 0x151   : > { %v396_v32 = vpop.f32.mrf.mxu0 }
 0x152   : > { %v436_v34 = vmax.f32 %v384_v27, %v420_v30  ;;  %v397_v35 = vadd.f32 %v2395_v46, %v396_v32  ;;  %v448_v42 = vpack.c.bf16 %v438_v31, %v437_v36  ;;  %v425_v47 = vmul.f32 0.01, %v405_v37 }
 0x153   : > { %v1769_v38 = vpop.f32.mrf.mxu0 }
 0x154   : > { %v408_v39 = vadd.f32 %v1769_v38, %v2395_v46  ;;  %v447_v40 = vpack.c.bf16 %v436_v34, %v435_v33  ;;  %v423_v43 = vmul.f32 0.01, %v397_v35  ;;  %v441_v52 = vmax.f32 %v405_v37, %v425_v47 }
 0x155   : > { %v399_v41 = vpop.f32.mrf.mxu0 }
 0x156   : > { %v426_v44 = vmul.f32 0.01, %v408_v39  ;;  %v400_v45 = vadd.f32 %v2395_v46, %v399_v41  ;;  %1794 = vmatprep.mubr.bf16.mxu1 %v447_v40  ;;  %v439_v50 = vmax.f32 %v397_v35, %v423_v43  ;;  %v2027_v46 = vld [vmem:[#allocation7 + $0xf8] sm:$0xff]  }
 0x157   : > { %1795 = vmatmul.mubr.bf16.gmra.mxu1 %v448_v42  ;;  %1834 = vmatprep.subr.bf16.mxu1 %v2027_v46 }
 0x158   : > { %v424_v48 = vmul.f32 0.01, %v400_v45  ;;  %v442_v49 = vmax.f32 %v408_v39, %v426_v44  ;;  %1835 = vmatpush3.bf16.msra.mxu1 %v2027_v46 }
 0x159   : > { %1836 = vmatprep.subr.bf16.mxu1 %v2028_v58 }
 0x15a   : > { %v440_v51 = vmax.f32 %v400_v45, %v424_v48  ;;  %v450_v54 = vpack.c.bf16 %v442_v49, %v441_v52 }
 0x15c   : > { %v449_v53 = vpack.c.bf16 %v440_v51, %v439_v50  ;;  %1837 = vmatpush3.bf16.msra.mxu1 %v2028_v58 }
 0x15d   : > { %1838 = vmatprep.subr.bf16.mxu1 %v2029_v59 }
 0x15e   : > { %1798 = vmatprep.mubr.bf16.mxu1 %v449_v53 }
 0x15f   : > { %1799 = vmatmul.mubr.bf16.gmra.mxu1 %v450_v54 }
 0x160   : > { %1839 = vmatpush3.bf16.msra.mxu1 %v2029_v59 }
 0x161   : > { %1840 = vmatprep.subr.bf16.mxu1 %v2030_v60 }
 0x164   : > { %1841 = vmatpush3.bf16.msra.mxu1 %v2030_v60 }
 0x165   : > { %1842 = vmatprep.subr.bf16.mxu1 %v2031_v61 }
 0x168   : > { %1843 = vmatpush3.bf16.msra.mxu1 %v2031_v61 }
 0x207   : > { %v1788_v62 = vpop.f32.mrf.mxu1 }
 0x208   : > { %v564_v2 = vadd.f32 %v1788_v62, %v2413_v63 }
 0x209   : > { %v555_v0 = vpop.f32.mrf.mxu1 }
 0x20a   : > { %v556_v1 = vadd.f32 %v2413_v63, %v555_v0  ;;  %v620_v9 = vmul.f32 0.01, %v564_v2 }
 0x20b   : > { %v1789_v3 = vpop.f32.mrf.mxu1 }
 0x20c   : > { %v567_v4 = vadd.f32 %v1789_v3, %v2413_v63  ;;  %v618_v6 = vmul.f32 0.01, %v556_v1  ;;  %v636_v17 = vmax.f32 %v564_v2, %v620_v9  ;;  %v2033_v9 = vld [vmem:[#allocation7 + $0xc8] sm:$0xff]  }
 0x20d   : > { %v558_v5 = vpop.f32.mrf.mxu1 }
 0x20e   : > { %v621_v7 = vmul.f32 0.01, %v567_v4  ;;  %v559_v8 = vadd.f32 %v2413_v63, %v558_v5  ;;  %v634_v14 = vmax.f32 %v556_v1, %v618_v6 }
 0x20f   : > { %v1792_v10 = vpop.f32.mrf.mxu1 }
 0x210   : > { %v619_v11 = vmul.f32 0.01, %v559_v8  ;;  %v637_v12 = vmax.f32 %v567_v4, %v621_v7  ;;  %v580_v18 = vadd.f32 %v1792_v10, %v2413_v63  ;;  %v2034_v10 = vld [vmem:[#allocation7 + $0xc0] sm:$0xff]  }
 0x211   : > { %v571_v13 = vpop.f32.mrf.mxu1 }
 0x212   : > { %v635_v15 = vmax.f32 %v559_v8, %v619_v11  ;;  %v572_v16 = vadd.f32 %v2413_v63, %v571_v13  ;;  %v651_v22 = vpack.c.bf16 %v637_v12, %v636_v17  ;;  %v624_v27 = vmul.f32 0.01, %v580_v18  ;;  %v2032_v8 = vld [vmem:[#allocation7 + $0xd0] sm:$0xff]   ;;  %v2037_v12 = vld [vmem:[#allocation7 + $0x128] sm:$0xff]   ;;  %v2038_v13 = vld [vmem:[#allocation7 + $0x120] sm:$0xff]  }
 0x213   : > { %v1793_v19 = vpop.f32.mrf.mxu1  ;;  %1844 = vmatprep.subr.bf16.mxu1 %v2032_v8  ;;  %v2036_v11 = vld [vmem:[#allocation7 + $0x130] sm:$0xff]  }
 0x214   : > { %v583_v20 = vadd.f32 %v1793_v19, %v2413_v63  ;;  %v650_v21 = vpack.c.bf16 %v635_v15, %v634_v14  ;;  %v622_v24 = vmul.f32 0.01, %v572_v16  ;;  %v640_v35 = vmax.f32 %v580_v18, %v624_v27  ;;  %1845 = vmatpush3.bf16.msra.mxu1 %v2032_v8  ;;  %v2039_v14 = vld [vmem:[#allocation7 + $0x118] sm:$0xff]  }
 0x215   : > { %v574_v23 = vpop.f32.mrf.mxu1  ;;  %1846 = vmatprep.subr.bf16.mxu1 %v2033_v9 }
 0x216   : > { %v625_v25 = vmul.f32 0.01, %v583_v20  ;;  %v575_v26 = vadd.f32 %v2413_v63, %v574_v23  ;;  %1818 = vmatprep.mubr.bf16.mxu0 %v650_v21  ;;  %v638_v32 = vmax.f32 %v572_v16, %v622_v24  ;;  %v2431_v16 = vld [vmem:[#allocation9 + $0x2] ss:$0 sm:$0xff] }
 0x217   : > { %v1796_v28 = vpop.f32.mrf.mxu1  ;;  %1819 = vmatmul.mubr.bf16.vlgmr.msra.gmra.mxu0 %v651_v22 }
 0x218   : > { %v623_v29 = vmul.f32 0.01, %v575_v26  ;;  %v641_v30 = vmax.f32 %v583_v20, %v625_v25  ;;  %v596_v36 = vadd.f32 %v1796_v28, %v2413_v63  ;;  %1847 = vmatpush3.bf16.msra.mxu1 %v2033_v9 }
 0x219   : > { %v587_v31 = vpop.f32.mrf.mxu1  ;;  %1848 = vmatprep.subr.bf16.mxu1 %v2034_v10 }
 0x21a   : > { %v639_v33 = vmax.f32 %v575_v26, %v623_v29  ;;  %v588_v34 = vadd.f32 %v2413_v63, %v587_v31  ;;  %v653_v41 = vpack.c.bf16 %v641_v30, %v640_v35  ;;  %v628_v45 = vmul.f32 0.01, %v596_v36 }
 0x21b   : > { %v1797_v37 = vpop.f32.mrf.mxu1 }
 0x21c   : > { %v599_v38 = vadd.f32 %v1797_v37, %v2413_v63  ;;  %v652_v39 = vpack.c.bf16 %v639_v33, %v638_v32  ;;  %v626_v42 = vmul.f32 0.01, %v588_v34  ;;  %v644_v54 = vmax.f32 %v596_v36, %v628_v45  ;;  %1849 = vmatpush3.bf16.msra.mxu1 %v2034_v10 }
 0x21d   : > { %v590_v40 = vpop.f32.mrf.mxu1 }
 0x21e   : > { %v629_v43 = vmul.f32 0.01, %v599_v38  ;;  %v591_v44 = vadd.f32 %v2413_v63, %v590_v40  ;;  %1822 = vmatprep.mubr.bf16.mxu0 %v652_v39  ;;  %v642_v51 = vmax.f32 %v588_v34, %v626_v42 }
 0x21f   : > { %v1800_v47 = vpop.f32.mrf.mxu1  ;;  %1823 = vmatmul.mubr.bf16.gmra.mxu0 %v653_v41 }
 0x220   : > { %v627_v48 = vmul.f32 0.01, %v591_v44  ;;  %v645_v49 = vmax.f32 %v599_v38, %v629_v43  ;;  %v612_v55 = vadd.f32 %v1800_v47, %v2413_v63 }
 0x221   : > { %v603_v50 = vpop.f32.mrf.mxu1 }
 0x222   : > { %v643_v52 = vmax.f32 %v591_v44, %v627_v48  ;;  %v604_v53 = vadd.f32 %v2413_v63, %v603_v50  ;;  %v655_v59 = vpack.c.bf16 %v645_v49, %v644_v54  ;;  %v632_v0 = vmul.f32 0.01, %v612_v55 }
 0x223   : > { %v1801_v56 = vpop.f32.mrf.mxu1 }
 0x224   : > { %v615_v57 = vadd.f32 %v1801_v56, %v2413_v63  ;;  %v654_v46 = vpack.c.bf16 %v643_v52, %v642_v51  ;;  %v630_v60 = vmul.f32 0.01, %v604_v53  ;;  %v648_v5 = vmax.f32 %v612_v55, %v632_v0 }
 0x225   : > { %v606_v58 = vpop.f32.mrf.mxu1 }
 0x226   : > { %v633_v61 = vmul.f32 0.01, %v615_v57  ;;  %v607_v62 = vadd.f32 %v2413_v63, %v606_v58  ;;  %1826 = vmatprep.mubr.bf16.mxu0 %v654_v46  ;;  %v646_v3 = vmax.f32 %v604_v53, %v630_v60  ;;  %v2035_v63 = vld [vmem:[#allocation7 + $0x138] sm:$0xff]  }
 0x227   : > { %1827 = vmatmul.mubr.bf16.gmra.mxu0 %v655_v59  ;;  %1866 = vmatprep.subr.bf16.mxu0 %v2035_v63 }
 0x228   : > { %v631_v1 = vmul.f32 0.01, %v607_v62  ;;  %v649_v2 = vmax.f32 %v615_v57, %v633_v61  ;;  %1867 = vmatpush3.bf16.msra.mxu0 %v2035_v63 }
 0x229   : > { %1868 = vmatprep.subr.bf16.mxu0 %v2036_v11 }
 0x22a   : > { %v647_v4 = vmax.f32 %v607_v62, %v631_v1  ;;  %v657_v7 = vpack.c.bf16 %v649_v2, %v648_v5 }
 0x22c   : > { %v656_v6 = vpack.c.bf16 %v647_v4, %v646_v3  ;;  %1869 = vmatpush3.bf16.msra.mxu0 %v2036_v11 }
 0x22d   : > { %1870 = vmatprep.subr.bf16.mxu0 %v2037_v12 }
 0x22e   : > { %1830 = vmatprep.mubr.bf16.mxu0 %v656_v6 }
 0x22f   : > { %1831 = vmatmul.mubr.bf16.gmra.mxu0 %v657_v7 }
 0x230   : > { %1871 = vmatpush3.bf16.msra.mxu0 %v2037_v12 }
 0x231   : > { %1872 = vmatprep.subr.bf16.mxu0 %v2038_v13 }
 0x234   : > { %1873 = vmatpush3.bf16.msra.mxu0 %v2038_v13 }
 0x235   : > { %1874 = vmatprep.subr.bf16.mxu0 %v2039_v14 }
 0x238   : > { %1875 = vmatpush3.bf16.msra.mxu0 %v2039_v14 }
 0x2d7   : > { %v1820_v15 = vpop.f32.mrf.mxu0 }
 0x2d8   : > { %v771_v19 = vadd.f32 %v1820_v15, %v2431_v16 }
 0x2d9   : > { %v762_v17 = vpop.f32.mrf.mxu0 }
 0x2da   : > { %v763_v18 = vadd.f32 %v2431_v16, %v762_v17  ;;  %v827_v26 = vmul.f32 0.01, %v771_v19 }
 0x2db   : > { %v1821_v20 = vpop.f32.mrf.mxu0 }
 0x2dc   : > { %v774_v21 = vadd.f32 %v1821_v20, %v2431_v16  ;;  %v825_v23 = vmul.f32 0.01, %v763_v18  ;;  %v843_v34 = vmax.f32 %v771_v19, %v827_v26  ;;  %v2041_v26 = vld [vmem:[#allocation7 + $0x108] sm:$0xff]  }
 0x2dd   : > { %v765_v22 = vpop.f32.mrf.mxu0 }
 0x2de   : > { %v828_v24 = vmul.f32 0.01, %v774_v21  ;;  %v766_v25 = vadd.f32 %v2431_v16, %v765_v22  ;;  %v841_v31 = vmax.f32 %v763_v18, %v825_v23 }
 0x2df   : > { %v1824_v27 = vpop.f32.mrf.mxu0 }
 0x2e0   : > { %v826_v28 = vmul.f32 0.01, %v766_v25  ;;  %v844_v29 = vmax.f32 %v774_v21, %v828_v24  ;;  %v787_v35 = vadd.f32 %v1824_v27, %v2431_v16  ;;  %v2042_v27 = vld [vmem:[#allocation7 + $0x100] sm:$0xff]  }
 0x2e1   : > { %v778_v30 = vpop.f32.mrf.mxu0 }
 0x2e2   : > { %v842_v32 = vmax.f32 %v766_v25, %v826_v28  ;;  %v779_v33 = vadd.f32 %v2431_v16, %v778_v30  ;;  %v858_v39 = vpack.c.bf16 %v844_v29, %v843_v34  ;;  %v831_v44 = vmul.f32 0.01, %v787_v35  ;;  %v2040_v25 = vld [vmem:[#allocation7 + $0x110] sm:$0xff]   ;;  %v2045_v29 = vld [vmem:[#allocation7 + $0x168] sm:$0xff]   ;;  %v2046_v30 = vld [vmem:[#allocation7 + $0x160] sm:$0xff]  }
 0x2e3   : > { %v1825_v36 = vpop.f32.mrf.mxu0  ;;  %1876 = vmatprep.subr.bf16.mxu0 %v2040_v25  ;;  %v2044_v28 = vld [vmem:[#allocation7 + $0x170] sm:$0xff]  }
 0x2e4   : > { %v790_v37 = vadd.f32 %v1825_v36, %v2431_v16  ;;  %v857_v38 = vpack.c.bf16 %v842_v32, %v841_v31  ;;  %v829_v41 = vmul.f32 0.01, %v779_v33  ;;  %v847_v53 = vmax.f32 %v787_v35, %v831_v44  ;;  %1877 = vmatpush3.bf16.msra.mxu0 %v2040_v25  ;;  %v2047_v31 = vld [vmem:[#allocation7 + $0x158] sm:$0xff]  }
 0x2e5   : > { %v781_v40 = vpop.f32.mrf.mxu0  ;;  %1878 = vmatprep.subr.bf16.mxu0 %v2041_v26 }
 0x2e6   : > { %v832_v42 = vmul.f32 0.01, %v790_v37  ;;  %v782_v43 = vadd.f32 %v2431_v16, %v781_v40  ;;  %1850 = vmatprep.mubr.bf16.mxu1 %v857_v38  ;;  %v845_v50 = vmax.f32 %v779_v33, %v829_v41  ;;  %v2449_v33 = vld [vmem:[#allocation9 + $0x3] ss:$0 sm:$0xff] }
 0x2e7   : > { %v1828_v45 = vpop.f32.mrf.mxu0  ;;  %1851 = vmatmul.mubr.bf16.vlgmr.msra.gmra.mxu1 %v858_v39 }
 0x2e8   : > { %v830_v47 = vmul.f32 0.01, %v782_v43  ;;  %v848_v48 = vmax.f32 %v790_v37, %v832_v42  ;;  %v803_v54 = vadd.f32 %v1828_v45, %v2431_v16  ;;  %1879 = vmatpush3.bf16.msra.mxu0 %v2041_v26 }
 0x2e9   : > { %v794_v49 = vpop.f32.mrf.mxu0  ;;  %1880 = vmatprep.subr.bf16.mxu0 %v2042_v27 }
 0x2ea   : > { %v846_v51 = vmax.f32 %v782_v43, %v830_v47  ;;  %v795_v52 = vadd.f32 %v2431_v16, %v794_v49  ;;  %v860_v58 = vpack.c.bf16 %v848_v48, %v847_v53  ;;  %v835_v62 = vmul.f32 0.01, %v803_v54 }
 0x2eb   : > { %v1829_v55 = vpop.f32.mrf.mxu0 }
 0x2ec   : > { %v806_v56 = vadd.f32 %v1829_v55, %v2431_v16  ;;  %v859_v57 = vpack.c.bf16 %v846_v51, %v845_v50  ;;  %v833_v59 = vmul.f32 0.01, %v795_v52  ;;  %v851_v7 = vmax.f32 %v803_v54, %v835_v62  ;;  %1881 = vmatpush3.bf16.msra.mxu0 %v2042_v27 }
 0x2ed   : > { %v797_v46 = vpop.f32.mrf.mxu0 }
 0x2ee   : > { %v836_v60 = vmul.f32 0.01, %v806_v56  ;;  %v798_v61 = vadd.f32 %v2431_v16, %v797_v46  ;;  %1854 = vmatprep.mubr.bf16.mxu1 %v859_v57  ;;  %v849_v4 = vmax.f32 %v795_v52, %v833_v59 }
 0x2ef   : > { %v1832_v0 = vpop.f32.mrf.mxu0  ;;  %1855 = vmatmul.mubr.bf16.gmra.mxu1 %v860_v58 }
 0x2f0   : > { %v834_v1 = vmul.f32 0.01, %v798_v61  ;;  %v852_v2 = vmax.f32 %v806_v56, %v836_v60  ;;  %v819_v8 = vadd.f32 %v1832_v0, %v2431_v16 }
 0x2f1   : > { %v810_v3 = vpop.f32.mrf.mxu0 }
 0x2f2   : > { %v850_v5 = vmax.f32 %v798_v61, %v834_v1  ;;  %v811_v6 = vadd.f32 %v2431_v16, %v810_v3  ;;  %v862_v12 = vpack.c.bf16 %v852_v2, %v851_v7  ;;  %v839_v17 = vmul.f32 0.01, %v819_v8 }
 0x2f3   : > { %v1833_v9 = vpop.f32.mrf.mxu0 }
 0x2f4   : > { %v822_v10 = vadd.f32 %v1833_v9, %v2431_v16  ;;  %v861_v63 = vpack.c.bf16 %v850_v5, %v849_v4  ;;  %v837_v13 = vmul.f32 0.01, %v811_v6  ;;  %v855_v22 = vmax.f32 %v819_v8, %v839_v17 }
 0x2f5   : > { %v813_v11 = vpop.f32.mrf.mxu0 }
 0x2f6   : > { %v840_v14 = vmul.f32 0.01, %v822_v10  ;;  %v814_v15 = vadd.f32 %v2431_v16, %v813_v11  ;;  %1858 = vmatprep.mubr.bf16.mxu1 %v861_v63  ;;  %v853_v20 = vmax.f32 %v811_v6, %v837_v13  ;;  %v2043_v16 = vld [vmem:[#allocation7 + $0x178] sm:$0xff]  }
 0x2f7   : > { %1859 = vmatmul.mubr.bf16.gmra.mxu1 %v862_v12  ;;  %1898 = vmatprep.subr.bf16.mxu1 %v2043_v16 }
 0x2f8   : > { %v838_v18 = vmul.f32 0.01, %v814_v15  ;;  %v856_v19 = vmax.f32 %v822_v10, %v840_v14  ;;  %1899 = vmatpush3.bf16.msra.mxu1 %v2043_v16 }
 0x2f9   : > { %1900 = vmatprep.subr.bf16.mxu1 %v2044_v28 }
 0x2fa   : > { %v854_v21 = vmax.f32 %v814_v15, %v838_v18  ;;  %v864_v24 = vpack.c.bf16 %v856_v19, %v855_v22 }
 0x2fc   : > { %v863_v23 = vpack.c.bf16 %v854_v21, %v853_v20  ;;  %1901 = vmatpush3.bf16.msra.mxu1 %v2044_v28 }
 0x2fd   : > { %1902 = vmatprep.subr.bf16.mxu1 %v2045_v29 }
 0x2fe   : > { %1862 = vmatprep.mubr.bf16.mxu1 %v863_v23 }
 0x2ff   : > { %1863 = vmatmul.mubr.bf16.gmra.mxu1 %v864_v24 }
 0x300   : > { %1903 = vmatpush3.bf16.msra.mxu1 %v2045_v29 }
 0x301   : > { %1904 = vmatprep.subr.bf16.mxu1 %v2046_v30 }
 0x304   : > { %1905 = vmatpush3.bf16.msra.mxu1 %v2046_v30 }
 0x305   : > { %1906 = vmatprep.subr.bf16.mxu1 %v2047_v31 }
 0x308   : > { %1907 = vmatpush3.bf16.msra.mxu1 %v2047_v31 }
 0x3a7   : > { %v1852_v32 = vpop.f32.mrf.mxu1 }
 0x3a8   : > { %v978_v36 = vadd.f32 %v1852_v32, %v2449_v33 }
 0x3a9   : > { %v969_v34 = vpop.f32.mrf.mxu1 }
 0x3aa   : > { %v970_v35 = vadd.f32 %v2449_v33, %v969_v34  ;;  %v1034_v43 = vmul.f32 0.01, %v978_v36 }
 0x3ab   : > { %v1853_v37 = vpop.f32.mrf.mxu1 }
 0x3ac   : > { %v981_v38 = vadd.f32 %v1853_v37, %v2449_v33  ;;  %v1032_v40 = vmul.f32 0.01, %v970_v35  ;;  %v1050_v52 = vmax.f32 %v978_v36, %v1034_v43  ;;  %v2049_v43 = vld [vmem:[#allocation7 + $0x148] sm:$0xff]  }
 0x3ad   : > { %v972_v39 = vpop.f32.mrf.mxu1 }
 0x3ae   : > { %v1035_v41 = vmul.f32 0.01, %v981_v38  ;;  %v973_v42 = vadd.f32 %v2449_v33, %v972_v39  ;;  %v1048_v49 = vmax.f32 %v970_v35, %v1032_v40 }
 0x3af   : > { %v1856_v44 = vpop.f32.mrf.mxu1 }
 0x3b0   : > { %v1033_v45 = vmul.f32 0.01, %v973_v42  ;;  %v1051_v47 = vmax.f32 %v981_v38, %v1035_v41  ;;  %v994_v53 = vadd.f32 %v1856_v44, %v2449_v33  ;;  %v2050_v44 = vld [vmem:[#allocation7 + $0x140] sm:$0xff]  }
 0x3b1   : > { %v985_v48 = vpop.f32.mrf.mxu1 }
 0x3b2   : > { %v1049_v50 = vmax.f32 %v973_v42, %v1033_v45  ;;  %v986_v51 = vadd.f32 %v2449_v33, %v985_v48  ;;  %v1065_v57 = vpack.c.bf16 %v1051_v47, %v1050_v52  ;;  %v1038_v61 = vmul.f32 0.01, %v994_v53  ;;  %v2048_v42 = vld [vmem:[#allocation7 + $0x150] sm:$0xff]   ;;  %v2467_v45 = vld [vmem:[#allocation9 + $0x4] ss:$0 sm:$0xff] }
 0x3b3   : > { %v1857_v54 = vpop.f32.mrf.mxu1  ;;  %1908 = vmatprep.subr.bf16.mxu1 %v2048_v42 }
 0x3b4   : > { %v997_v55 = vadd.f32 %v1857_v54, %v2449_v33  ;;  %v1064_v56 = vpack.c.bf16 %v1049_v50, %v1048_v49  ;;  %v1036_v58 = vmul.f32 0.01, %v986_v51  ;;  %v1054_v6 = vmax.f32 %v994_v53, %v1038_v61  ;;  %1909 = vmatpush3.bf16.msra.mxu1 %v2048_v42 }
 0x3b5   : > { %v988_v46 = vpop.f32.mrf.mxu1  ;;  %1910 = vmatprep.subr.bf16.mxu1 %v2049_v43 }
 0x3b6   : > { %v1039_v59 = vmul.f32 0.01, %v997_v55  ;;  %v989_v60 = vadd.f32 %v2449_v33, %v988_v46  ;;  %1882 = vmatprep.mubr.bf16.mxu0 %v1064_v56  ;;  %v1052_v3 = vmax.f32 %v986_v51, %v1036_v58 }
 0x3b7   : > { %v1860_v62 = vpop.f32.mrf.mxu1  ;;  %1883 = vmatmul.mubr.bf16.vlgmr.msra.gmra.mxu0 %v1065_v57 }
 0x3b8   : > { %v1037_v0 = vmul.f32 0.01, %v989_v60  ;;  %v1055_v1 = vmax.f32 %v997_v55, %v1039_v59  ;;  %v1010_v7 = vadd.f32 %v1860_v62, %v2449_v33  ;;  %1911 = vmatpush3.bf16.msra.mxu1 %v2049_v43 }
 0x3b9   : > { %v1001_v2 = vpop.f32.mrf.mxu1  ;;  %1912 = vmatprep.subr.bf16.mxu1 %v2050_v44 }
 0x3ba   : > { %v1053_v4 = vmax.f32 %v989_v60, %v1037_v0  ;;  %v1002_v5 = vadd.f32 %v2449_v33, %v1001_v2  ;;  %v1067_v11 = vpack.c.bf16 %v1055_v1, %v1054_v6  ;;  %v1042_v15 = vmul.f32 0.01, %v1010_v7 }
 0x3bb   : > { %v1861_v8 = vpop.f32.mrf.mxu1 }
 0x3bc   : > { %v1013_v9 = vadd.f32 %v1861_v8, %v2449_v33  ;;  %v1066_v10 = vpack.c.bf16 %v1053_v4, %v1052_v3  ;;  %v1040_v12 = vmul.f32 0.01, %v1002_v5  ;;  %v1058_v24 = vmax.f32 %v1010_v7, %v1042_v15  ;;  %1913 = vmatpush3.bf16.msra.mxu1 %v2050_v44 }
 0x3bd   : > { %v1004_v63 = vpop.f32.mrf.mxu1 }
 0x3be   : > { %v1043_v13 = vmul.f32 0.01, %v1013_v9  ;;  %v1005_v14 = vadd.f32 %v2449_v33, %v1004_v63  ;;  %1886 = vmatprep.mubr.bf16.mxu0 %v1066_v10  ;;  %v1056_v21 = vmax.f32 %v1002_v5, %v1040_v12 }
 0x3bf   : > { %v1864_v17 = vpop.f32.mrf.mxu1  ;;  %1887 = vmatmul.mubr.bf16.gmra.mxu0 %v1067_v11 }
 0x3c0   : > { %v1041_v18 = vmul.f32 0.01, %v1005_v14  ;;  %v1059_v19 = vmax.f32 %v1013_v9, %v1043_v13  ;;  %v1026_v25 = vadd.f32 %v1864_v17, %v2449_v33 }
 0x3c1   : > { %v1017_v20 = vpop.f32.mrf.mxu1 }
 0x3c2   : > { %v1057_v22 = vmax.f32 %v1005_v14, %v1041_v18  ;;  %v1018_v23 = vadd.f32 %v2449_v33, %v1017_v20  ;;  %v1069_v29 = vpack.c.bf16 %v1059_v19, %v1058_v24  ;;  %v1046_v34 = vmul.f32 0.01, %v1026_v25 }
 0x3c3   : > { %v1865_v26 = vpop.f32.mrf.mxu1 }
 0x3c4   : > { %v1029_v27 = vadd.f32 %v1865_v26, %v2449_v33  ;;  %v1068_v16 = vpack.c.bf16 %v1057_v22, %v1056_v21  ;;  %v1044_v30 = vmul.f32 0.01, %v1018_v23  ;;  %v1062_v39 = vmax.f32 %v1026_v25, %v1046_v34 }
 0x3c5   : > { %v1020_v28 = vpop.f32.mrf.mxu1 }
 0x3c6   : > { %v1047_v31 = vmul.f32 0.01, %v1029_v27  ;;  %v1021_v32 = vadd.f32 %v2449_v33, %v1020_v28  ;;  %1890 = vmatprep.mubr.bf16.mxu0 %v1068_v16  ;;  %v1060_v37 = vmax.f32 %v1018_v23, %v1044_v30 }
 0x3c7   : > { %1891 = vmatmul.mubr.bf16.gmra.mxu0 %v1069_v29 }
 0x3c8   : > { %v1045_v35 = vmul.f32 0.01, %v1021_v32  ;;  %v1063_v36 = vmax.f32 %v1029_v27, %v1047_v31 }
 0x3ca   : > { %v1061_v38 = vmax.f32 %v1021_v32, %v1045_v35  ;;  %v1071_v41 = vpack.c.bf16 %v1063_v36, %v1062_v39 }
 0x3cc   : > { %v1070_v40 = vpack.c.bf16 %v1061_v38, %v1060_v37 }
 0x3ce   : > { %1894 = vmatprep.mubr.bf16.mxu0 %v1070_v40 }
 0x3cf   : > { %1895 = vmatmul.mubr.bf16.gmra.mxu0 %v1071_v41 }
 0x477   : > { %v1884_v33 = vpop.f32.mrf.mxu0 }
 0x478   : > { %v1185_v49 = vadd.f32 %v1884_v33, %v2467_v45 }
 0x479   : > { %v1176_v47 = vpop.f32.mrf.mxu0 }
 0x47a   : > { %v1177_v48 = vadd.f32 %v2467_v45, %v1176_v47  ;;  %v1241_v56 = vmul.f32 0.01, %v1185_v49 }
 0x47b   : > { %v1885_v50 = vpop.f32.mrf.mxu0 }
 0x47c   : > { %v1188_v51 = vadd.f32 %v1885_v50, %v2467_v45  ;;  %v1239_v53 = vmul.f32 0.01, %v1177_v48  ;;  %v1257_v0 = vmax.f32 %v1185_v49, %v1241_v56 }
 0x47d   : > { %v1179_v52 = vpop.f32.mrf.mxu0 }
 0x47e   : > { %v1242_v54 = vmul.f32 0.01, %v1188_v51  ;;  %v1180_v55 = vadd.f32 %v2467_v45, %v1179_v52  ;;  %v1255_v60 = vmax.f32 %v1177_v48, %v1239_v53 }
 0x47f   : > { %v1888_v57 = vpop.f32.mrf.mxu0 }
 0x480   : > { %v1240_v46 = vmul.f32 0.01, %v1180_v55  ;;  %v1258_v58 = vmax.f32 %v1188_v51, %v1242_v54  ;;  %v1201_v1 = vadd.f32 %v1888_v57, %v2467_v45 }
 0x481   : > { %v1192_v59 = vpop.f32.mrf.mxu0 }
 0x482   : > { %v1256_v61 = vmax.f32 %v1180_v55, %v1240_v46  ;;  %v1193_v62 = vadd.f32 %v2467_v45, %v1192_v59  ;;  %v1272_v5 = vpack.c.bf16 %v1258_v58, %v1257_v0  ;;  %v1245_v10 = vmul.f32 0.01, %v1201_v1  ;;  %v1626_v55 = vld [vmem:[#allocation9 + $0x5] ss:$0 sm:$0xff] }
 0x483   : > { %v1889_v2 = vpop.f32.mrf.mxu0 }
 0x484   : > { %v1204_v3 = vadd.f32 %v1889_v2, %v2467_v45  ;;  %v1271_v4 = vpack.c.bf16 %v1256_v61, %v1255_v60  ;;  %v1243_v7 = vmul.f32 0.01, %v1193_v62  ;;  %v1261_v18 = vmax.f32 %v1201_v1, %v1245_v10 }
 0x485   : > { %v1195_v6 = vpop.f32.mrf.mxu0 }
 0x486   : > { %v1246_v8 = vmul.f32 0.01, %v1204_v3  ;;  %v1196_v9 = vadd.f32 %v2467_v45, %v1195_v6  ;;  %1914 = vmatprep.mubr.bf16.mxu1 %v1271_v4  ;;  %v1259_v14 = vmax.f32 %v1193_v62, %v1243_v7 }
 0x487   : > { %v1892_v63 = vpop.f32.mrf.mxu0  ;;  %1915 = vmatmul.mubr.bf16.vlgmr.msra.gmra.mxu1 %v1272_v5 }
 0x488   : > { %v1244_v11 = vmul.f32 0.01, %v1196_v9  ;;  %v1262_v12 = vmax.f32 %v1204_v3, %v1246_v8  ;;  %v1217_v19 = vadd.f32 %v1892_v63, %v2467_v45 }
 0x489   : > { %v1208_v13 = vpop.f32.mrf.mxu0 }
 0x48a   : > { %v1260_v15 = vmax.f32 %v1196_v9, %v1244_v11  ;;  %v1209_v17 = vadd.f32 %v2467_v45, %v1208_v13  ;;  %v1274_v24 = vpack.c.bf16 %v1262_v12, %v1261_v18  ;;  %v1249_v16 = vmul.f32 0.01, %v1217_v19 }
 0x48b   : > { %v1893_v20 = vpop.f32.mrf.mxu0 }
 0x48c   : > { %v1220_v21 = vadd.f32 %v1893_v20, %v2467_v45  ;;  %v1273_v22 = vpack.c.bf16 %v1260_v15, %v1259_v14  ;;  %v1247_v25 = vmul.f32 0.01, %v1209_v17  ;;  %v1265_v36 = vmax.f32 %v1217_v19, %v1249_v16 }
 0x48d   : > { %v1211_v23 = vpop.f32.mrf.mxu0 }
 0x48e   : > { %v1250_v26 = vmul.f32 0.01, %v1220_v21  ;;  %v1212_v27 = vadd.f32 %v2467_v45, %v1211_v23  ;;  %1918 = vmatprep.mubr.bf16.mxu1 %v1273_v22  ;;  %v1263_v32 = vmax.f32 %v1209_v17, %v1247_v25 }
 0x48f   : > { %v1896_v28 = vpop.f32.mrf.mxu0  ;;  %1919 = vmatmul.mubr.bf16.gmra.mxu1 %v1274_v24 }
 0x490   : > { %v1248_v29 = vmul.f32 0.01, %v1212_v27  ;;  %v1266_v30 = vmax.f32 %v1220_v21, %v1250_v26  ;;  %v1233_v37 = vadd.f32 %v1896_v28, %v2467_v45 }
 0x491   : > { %v1224_v31 = vpop.f32.mrf.mxu0 }
 0x492   : > { %v1264_v34 = vmax.f32 %v1212_v27, %v1248_v29  ;;  %v1225_v35 = vadd.f32 %v2467_v45, %v1224_v31  ;;  %v1276_v42 = vpack.c.bf16 %v1266_v30, %v1265_v36  ;;  %v1253_v47 = vmul.f32 0.01, %v1233_v37 }
 0x493   : > { %v1897_v38 = vpop.f32.mrf.mxu0 }
 0x494   : > { %v1236_v39 = vadd.f32 %v1897_v38, %v2467_v45  ;;  %v1275_v40 = vpack.c.bf16 %v1264_v34, %v1263_v32  ;;  %v1251_v43 = vmul.f32 0.01, %v1225_v35  ;;  %v1269_v52 = vmax.f32 %v1233_v37, %v1253_v47 }
 0x495   : > { %v1227_v41 = vpop.f32.mrf.mxu0 }
 0x496   : > { %v1254_v44 = vmul.f32 0.01, %v1236_v39  ;;  %v1228_v33 = vadd.f32 %v2467_v45, %v1227_v41  ;;  %1922 = vmatprep.mubr.bf16.mxu1 %v1275_v40  ;;  %v1267_v50 = vmax.f32 %v1225_v35, %v1251_v43 }
 0x497   : > { %1923 = vmatmul.mubr.bf16.gmra.mxu1 %v1276_v42 }
 0x498   : > { %v1252_v48 = vmul.f32 0.01, %v1228_v33  ;;  %v1270_v49 = vmax.f32 %v1236_v39, %v1254_v44 }
 0x49a   : > { %v1268_v51 = vmax.f32 %v1228_v33, %v1252_v48  ;;  %v1278_v54 = vpack.c.bf16 %v1270_v49, %v1269_v52 }
 0x49c   : > { %v1277_v53 = vpack.c.bf16 %v1268_v51, %v1267_v50 }
 0x49e   : > { %1926 = vmatprep.mubr.bf16.mxu1 %v1277_v53 }
 0x49f   : > { %1927 = vmatmul.mubr.bf16.gmra.mxu1 %v1278_v54 }
 0x547   : > { %v1916_v56 = vpop.f32.mrf.mxu1 }
 0x548   : > { %v1392_v57 = vadd.f32 %v1916_v56, %v1626_v55 }
 0x549   : > { %v1383_v46 = vpop.f32.mrf.mxu1 }
 0x54a   : > { %1448 = vst [vmem:[%s2487_s20 + $0x10] sm:$0xff] %v1392_v57  ;;  %v1384_v45 = vadd.f32 %v1626_v55, %v1383_v46 }
 0x54b   : > { %v1917_v58 = vpop.f32.mrf.mxu1 }
 0x54c   : > { %1446 = vst [vmem:[%s2487_s20] sm:$0xff] %v1384_v45  ;;  %v1395_v59 = vadd.f32 %v1917_v58, %v1626_v55 }
 0x54d   : > { %v1386_v60 = vpop.f32.mrf.mxu1 }
 0x54e   : > { %1449 = vst [vmem:[%s2487_s20 + $0x18] sm:$0xff] %v1395_v59  ;;  %v1387_v61 = vadd.f32 %v1626_v55, %v1386_v60 }
 0x54f   : > { %v1920_v62 = vpop.f32.mrf.mxu1 }
 0x550   : > { %1447 = vst [vmem:[%s2487_s20 + $0x8] sm:$0xff] %v1387_v61  ;;  %v1408_v0 = vadd.f32 %v1920_v62, %v1626_v55 }
 0x551   : > { %v1399_v1 = vpop.f32.mrf.mxu1 }
 0x552   : > { %1452 = vst [vmem:[%s2487_s20 + $0x30] sm:$0xff] %v1408_v0  ;;  %v1400_v2 = vadd.f32 %v1626_v55, %v1399_v1 }
 0x553   : > { %v1921_v3 = vpop.f32.mrf.mxu1 }
 0x554   : > { %1450 = vst [vmem:[%s2487_s20 + $0x20] sm:$0xff] %v1400_v2  ;;  %v1411_v4 = vadd.f32 %v1921_v3, %v1626_v55 }
 0x555   : > { %v1402_v5 = vpop.f32.mrf.mxu1 }
 0x556   : > { %1453 = vst [vmem:[%s2487_s20 + $0x38] sm:$0xff] %v1411_v4  ;;  %v1403_v6 = vadd.f32 %v1626_v55, %v1402_v5 }
 0x557   : > { %v1924_v7 = vpop.f32.mrf.mxu1 }
 0x558   : > { %1451 = vst [vmem:[%s2487_s20 + $0x28] sm:$0xff] %v1403_v6  ;;  %v1424_v8 = vadd.f32 %v1924_v7, %v1626_v55 }
 0x559   : > { %v1415_v9 = vpop.f32.mrf.mxu1 }
 0x55a   : > { %1456 = vst [vmem:[%s2487_s20 + $0x50] sm:$0xff] %v1424_v8  ;;  %v1416_v10 = vadd.f32 %v1626_v55, %v1415_v9 }
 0x55b   : > { %v1925_v63 = vpop.f32.mrf.mxu1 }
 0x55c   : > { %1454 = vst [vmem:[%s2487_s20 + $0x40] sm:$0xff] %v1416_v10  ;;  %v1427_v11 = vadd.f32 %v1925_v63, %v1626_v55 }
 0x55d   : > { %v1418_v12 = vpop.f32.mrf.mxu1 }
 0x55e   : > { %1457 = vst [vmem:[%s2487_s20 + $0x58] sm:$0xff] %v1427_v11  ;;  %v1419_v13 = vadd.f32 %v1626_v55, %v1418_v12 }
 0x55f   : > { %v1928_v14 = vpop.f32.mrf.mxu1 }
 0x560   : > { %1455 = vst [vmem:[%s2487_s20 + $0x48] sm:$0xff] %v1419_v13  ;;  %v1440_v15 = vadd.f32 %v1928_v14, %v1626_v55 }
 0x561   : > { %v1431_v17 = vpop.f32.mrf.mxu1 }
 0x562   : > { %1460 = vst [vmem:[%s2487_s20 + $0x70] sm:$0xff] %v1440_v15  ;;  %v1432_v18 = vadd.f32 %v1626_v55, %v1431_v17 }
 0x563   : > { %v1929_v19 = vpop.f32.mrf.mxu1 }
 0x564   : > { %1458 = vst [vmem:[%s2487_s20 + $0x60] sm:$0xff] %v1432_v18  ;;  %v1443_v20 = vadd.f32 %v1929_v19, %v1626_v55 }
 0x565   : > { %v1434_v21 = vpop.f32.mrf.mxu1 }
 0x566   : > { %1461 = vst [vmem:[%s2487_s20 + $0x78] sm:$0xff] %v1443_v20  ;;  %v1435_v22 = vadd.f32 %v1626_v55, %v1434_v21 }
 0x568   : > { %1459 = vst [vmem:[%s2487_s20 + $0x68] sm:$0xff] %v1435_v22 }
 0x569   : > { %2144 = shalt.err (!%p2141_p9)
}
 0x56a   : > { %s2145_s24 = scalar_lea.hbm %s2508_s5, 2048  ;;  %s2149_s28 = scalar_lea.hbm %s2559_s4, 4096 }
 0x56b   : > { %p2146_p13 = scmp.ne.s32.totalorder %s2508_s5, %s2145_s24  ;;  %p2150_p4 = scmp.lt.s32.totalorder %s2508_s5, %s2559_s4 }
 0x56c   : > { %p2151_p8 = scmp.lt.s32.totalorder %s2149_s28, %s2145_s24 }
 0x56d   : > { %p2147_p5 = pnand %p2146_p13, %p2575_p10 }
 0x56e   : > { %p2152_p3 = por %p2151_p8, %p2150_p4 }
 0x56f   : > { %p2148_p0 = pneg %p2147_p5 }
 0x571   : > { %p2153_p11 = pnand %p2152_p3, %p2148_p0 }
 0x573   : > { %2156 = shalt.err (!%p2153_p11)
}
 0x574   : > { %s2209_s9 = smov 128   ;;  %s2210_s20 = smov 8  }
 0x575   : > { %1940 = dma.vmem_to_hbm [thread:$0]  (%p2575_p10), %s2510_s27, 2048, %s2508_s5, %s1463_s11, %s2209_s9, %s2209_s9, %s2210_s20  }
 0x576 PF: > { %s1491_s22 = sand.u32 1, %s2187_s15   ;;  %p2576_p1 = scmp.ne.s32.totalorder %s2565_s21, 0 }
 0x577   : > { %p2577_p2 = scmp.ge.s32.totalorder %s2199_s17, 2  ;;  %s1492_s29 = scalar_lea.sflag [#allocation6], %s1491_s22 }
 0x579   : > { %p1954_p6 = pnand %p2577_p2, %p2576_p1 }
 0x57b   : > { %p1955_p12 = pneg %p1954_p6 }
 0x57d   : > { %2182 = dma.done.wait (%p1955_p12), %s1492_s29, 2048  }
 0x57e   : > { %2184 = vsyncadd (%p1955_p12), %s1492_s29, 4294965248  ;;  %p19_p7 = scmp.ge.s32.totalorder %s2308_s10, 4   ;;  %s2578_s15 = smov %s2191_s0 }
 0x57f   : > { %s2579_s0 = smov %s2195_s16  ;;  %s2580_s16 = smov %s2324_s14 }
 0x580   : > { %s2581_s17 = smov %s2308_s10  ;;  %21 = sbr.rel (!%p19_p7) target bundleno = 6 (0x6), region = 90 }
 0x585   :  { %1497 = vsyncpa [#allocation5], 1 }
 0x586   :  { %1499 = vsyncpa [#allocation5 + $0x1], 1 }
 0x587   :  { %1500 = vsyncpa [#allocation8], 1 }
 0x588   :  { %1501 = vsyncpa [#allocation6], 1 }
 0x589   :  { %1503 = vsyncpa [#allocation6 + $0x1], 1 }

</bundles_post_ra>
